<compile_context>
chip_gen: v6e
topology: v6e:2x2x1
jax: 0.10.0
libtpu: 0.0.40
codegen_flags: <defaults>
</compile_context>

<pallas_src>
import math

import jax
import jax.numpy as jnp
from jax.experimental import pallas as pl
from jax.experimental.pallas import tpu as pltpu


_LANE = 128                              # TPU lane width (fast axis)
_TARGET_BLOCK_BYTES = 4 * 1024 * 1024    # ~4 MiB per block per buffer
_SINGLE_STEP_BYTES = 256 * 1024          # below this, one grid step is cheapest
_VMEM_LIMIT_BYTES = 48 * 1024 * 1024     # headroom for 2x double-buffered 4 MiB blocks


def _sublane(itemsize: int) -> int:
    # Native sublane packing: f32 -> 8, bf16/f16 -> 16, int8/fp8 -> 32.
    return {4: 8, 2: 16, 1: 32}.get(itemsize, 8)


# ----------------------------------------------------------------------------
# Kernel: pure elementwise hard-sigmoid on one (row_block, cols) VMEM tile.
# ----------------------------------------------------------------------------
def _h_sigmoid_kernel(x_ref, o_ref):
    x = x_ref[...].astype(jnp.float32)
    # ReLU6(x + 3) / 6  (multiply by 1/6; <=1 ulp vs divide, well under 1e-6)
    y = jnp.clip(x + 3.0, 0.0, 6.0) * (1.0 / 6.0)
    o_ref[...] = y.astype(o_ref.dtype)


# ----------------------------------------------------------------------------
# Wrapper
# ----------------------------------------------------------------------------
@jax.jit
def h_sigmoid_pallas(x):
    orig_shape = x.shape
    dtype = x.dtype
    total = math.prod(orig_shape)

    itemsize = jnp.dtype(dtype).itemsize
    sub = _sublane(itemsize)

    # Free (no-copy) 2D view of the contiguous buffer.
    if total % _LANE == 0:
        cols = _LANE                                   # lane-dense: unmasked stores
    else:
        # Rare fallback: keep the natural trailing dim; "last dim == full array
        # dim" is permitted by BlockSpec, and this avoids any pad/slice HBM pass.
        cols = orig_shape[-1] if len(orig_shape) else 1
    rows = total // cols
    x2 = x.reshape(rows, cols)

    row_bytes = cols * itemsize
    total_bytes = rows * row_bytes

    # Largest block (in rows) that stays within the byte target, rounded down
    # to a sublane multiple (but at least one sublane group).
    max_block_rows = max(sub, (_TARGET_BLOCK_BYTES // max(row_bytes, 1)) // sub * sub)

    if total_bytes <= _SINGLE_STEP_BYTES or rows <= sub:
        # Tiny input: one grid step; block shape equals the full array dims.
        row_block = rows
    else:
        # At least 2 blocks (v7x megacore), each capped at ~_TARGET_BLOCK_BYTES.
        half = -(-rows // 2)                # ceil(rows / 2)
        half = -(-half // sub) * sub        # round up to a sublane multiple
        row_block = min(max_block_rows, half)

    grid_rows = pl.cdiv(rows, row_block)    # ragged last block handled by Pallas

    out2 = pl.pallas_call(
        _h_sigmoid_kernel,
        out_shape=jax.ShapeDtypeStruct((rows, cols), dtype),
        grid=(grid_rows,),
        in_specs=[pl.BlockSpec((row_block, cols), lambda i: (i, 0))],
        out_specs=pl.BlockSpec((row_block, cols), lambda i: (i, 0)),
        compiler_params=pltpu.CompilerParams(
            dimension_semantics=("parallel",),
            vmem_limit_bytes=_VMEM_LIMIT_BYTES),
    )(x2)

    return out2.reshape(orig_shape)


# ----------------------------------------------------------------------------
# Pure-JAX reference
# ----------------------------------------------------------------------------
def h_sigmoid_ref(x):
    return jnp.clip(x + 3.0, 0.0, 6.0) / 6.0


# ----------------------------------------------------------------------------
if __name__ == "__main__":
    key = jax.random.PRNGKey(0)

    # Primary case: small NCHW input from the module spec; scale so values span
    # both ReLU6 knees (-3 and +3).  total = 2048 -> single (16, 128) block.
    x = 4.0 * jax.random.normal(key, (2, 4, 16, 16), jnp.float32)
    out = jax.block_until_ready(h_sigmoid_pallas(x))
    ref = h_sigmoid_ref(x)
    err = float(jnp.max(jnp.abs(out - ref)))
    assert out.shape == x.shape, f"shape mismatch: {out.shape} vs {x.shape}"
    assert out.dtype == x.dtype, f"dtype mismatch: {out.dtype} vs {x.dtype}"
    assert err < 1e-6, f"mismatch vs reference: max abs err = {err}"

    # Secondary case: exercises the multi-block ("parallel" grid) path.
    k2 = jax.random.PRNGKey(0)
    x_big = 4.0 * jax.random.normal(k2, (2, 16, 64, 64), jnp.float32)
    out_big = jax.block_until_ready(h_sigmoid_pallas(x_big))
    err_big = float(jnp.max(jnp.abs(out_big - h_sigmoid_ref(x_big))))
    assert err_big < 1e-6, f"multi-block mismatch: max abs err = {err_big}"

    # Tertiary case: total not a multiple of 128 -> zero-copy ragged fallback.
    k3 = jax.random.PRNGKey(0)
    x_odd = 4.0 * jax.random.normal(k3, (3, 5, 7, 9), jnp.float32)
    out_odd = jax.block_until_ready(h_sigmoid_pallas(x_odd))
    err_odd = float(jnp.max(jnp.abs(out_odd - h_sigmoid_ref(x_odd))))
    assert err_odd < 1e-6, f"ragged-shape mismatch: max abs err = {err_odd}"

    print("KERNEL_OK")
</pallas_src>

<mosaic_0001>
module attributes {stable_mosaic.version = 11 : i64} {
  func.func @_h_sigmoid_kernel(%arg0: i32, %arg1: memref<16x128xf32, #tpu.memory_space<vmem>>, %arg2: memref<16x128xf32, #tpu.memory_space<vmem>>) attributes {dimension_semantics = [#tpu.dimension_semantics<parallel>], iteration_bounds = array<i64: 1>, scalar_prefetch = 0 : i64, scratch_operands = 0 : i64, tpu.core_type = #tpu.core_type<tc>, window_params = [{transform_indices = @transform_0, window_bounds = array<i64: 16, 128>}, {transform_indices = @transform_1, window_bounds = array<i64: 16, 128>}]} {
    %c0 = arith.constant 0 : index
    %c0_0 = arith.constant 0 : index
    %0 = vector.load %arg1[%c0, %c0_0] : memref<16x128xf32, #tpu.memory_space<vmem>>, vector<16x128xf32>
    %cst = arith.constant 3.000000e+00 : f32
    %1 = vector.broadcast %cst : f32 to vector<16x128xf32>
    %2 = arith.addf %0, %1 : vector<16x128xf32>
    %cst_1 = arith.constant 0.000000e+00 : f32
    %cst_2 = arith.constant 6.000000e+00 : f32
    %3 = vector.broadcast %cst_1 : f32 to vector<16x128xf32>
    %4 = arith.maximumf %3, %2 : vector<16x128xf32>
    %5 = vector.broadcast %cst_2 : f32 to vector<16x128xf32>
    %6 = arith.minimumf %5, %4 : vector<16x128xf32>
    %cst_3 = arith.constant 0.166666672 : f32
    %7 = vector.broadcast %cst_3 : f32 to vector<16x128xf32>
    %8 = arith.mulf %6, %7 : vector<16x128xf32>
    %c0_4 = arith.constant 0 : index
    %c0_5 = arith.constant 0 : index
    %9 = vector.load %arg2[%c0_4, %c0_5] : memref<16x128xf32, #tpu.memory_space<vmem>>, vector<16x128xf32>
    tpu.vector_store %arg2[%c0_4, %c0_5], %8 {strides = array<i32>} : memref<16x128xf32, #tpu.memory_space<vmem>>, vector<16x128xf32>,
    return
  }
  func.func @transform_0(%arg0: i32) -> (i32, i32) {
    %c0_i32 = arith.constant 0 : i32
    %c0_i32_0 = arith.constant 0 : i32
    return %arg0, %c0_i32 : i32, i32
  }
  func.func @transform_1(%arg0: i32) -> (i32, i32) {
    %c0_i32 = arith.constant 0 : i32
    %c0_i32_0 = arith.constant 0 : i32
    return %arg0, %c0_i32 : i32, i32
  }
}

</mosaic_0001>

<bundles_post_ra>
// kernel: h_sigmoid_pallas.1
= control target key start
LH: loop header
LB: loop body
LE: loop exit
PB: predicated region body
PF: predicated region fallthrough
CT: control target
= control target key end

     0   :  { %s46_s0 = inlined_call_operand.vmem [shape: f32[16,128], index: 0, kind: input, shape index: {}]   ;;  %s47_s1 = inlined_call_operand.vmem [shape: f32[16,128], index: 1, kind: output, shape index: {}]  }
   0x1   :  { %v8_v0 = vld [vmem:[%s46_s0] sm:$0xff]  ;;  %v9_v1 = vld [vmem:[%s46_s0 + $0x8] sm:$0xff] }
   0x2   :  { %v10_v2 = vadd.f32 3.0, %v8_v0  ;;  %v11_v3 = vadd.f32 3.0, %v9_v1 }
   0x4   :  { %v12_v4 = vmax.f32 %v10_v2, 0.0  ;;  %v13_v5 = vmax.f32 %v11_v3, 0.0 }
   0x6   :  { %v14_v6 = vmin.f32 %v12_v4, 6.0  ;;  %v15_v7 = vmin.f32 %v13_v5, 6.0 }
   0x8   :  { %v16_v8 = vmul.f32 0.16666667, %v14_v6  ;;  %v17_v9 = vmul.f32 0.16666667, %v15_v7 }
   0xa   :  { %18 = vst [vmem:[%s47_s1] sm:$0xff] %v16_v8  ;;  %19 = vst [vmem:[%s47_s1 + $0x8] sm:$0xff] %v17_v9 }

</bundles_post_ra>
